<compile_context>
chip_gen: v5e
topology: v5e:2x2
jax: 0.10.0
libtpu: 0.0.40
codegen_flags: <defaults>
</compile_context>

<pallas_src>
import jax
import jax.numpy as jnp
from jax.experimental import pallas as pl
from jax.experimental.pallas import tpu as pltpu

GOAL_SIZE = 16   # Goal.size() -- synthetic, see comment above
HIDDEN = 128
EMBED_DIM = 32   # GoalEmbedder.embed_dim


def goal_embedder_kernel(x_ref, w1_ref, b1_ref, w2_ref, b2_ref, o_ref):
    # bf16 MXU operands, f32 accumulation (single MXU pass on v5e/v6e/v7x).
    # The in-kernel f32->bf16 casts ride the VPU, which has plenty of slack
    # on this MXU-push-bound kernel; biases are added in f32.
    x = x_ref[...].astype(jnp.bfloat16)
    h = jnp.dot(x, w1_ref[...], preferred_element_type=jnp.float32)
    h = jnp.maximum(h + b1_ref[...], 0.0)
    o = jnp.dot(h.astype(jnp.bfloat16), w2_ref[...],
                preferred_element_type=jnp.float32)
    o_ref[...] = jnp.maximum(o + b2_ref[...], 0.0).astype(o_ref.dtype)


def _round_up(n, m):
    return ((n + m - 1) // m) * m


def _cdiv(a, b):
    return (a + b - 1) // b


def _choose_tile(B, block_rows):
    """Pick the batch tile (multiple of 8) and tile count.

    Prefers an even tile count >= 2 for non-tiny batches so the "parallel"
    grid axis load-balances across v7x's two TensorCores; a single tile is
    kept only where splitting is pure per-step overhead (tiny batches).
    """
    if B < 8:
        return B, 1                       # full-dim escape hatch for tiny B
    TB = min(block_rows, _round_up(B, 8))
    nt = _cdiv(B, TB)
    if nt == 1 and B > 256:
        nt = 2                            # give both v7x cores a tile
    if nt > 1 and nt % 2 == 1:
        nt += 1                           # even tile count for megacore balance
    TB = _round_up(_cdiv(B, nt), 8)
    nt = _cdiv(B, TB)
    return TB, nt


def goal_embedder_forward(x, w1, b1, w2, b2, *, block_rows=8192):
    """x: (B, GOAL_SIZE) f32 -> (B, EMBED_DIM) f32.

    w1: (GOAL_SIZE, HIDDEN) bf16, b1: (1, HIDDEN) f32,
    w2: (HIDDEN, EMBED_DIM) bf16, b2: (1, EMBED_DIM) f32.
    """
    B = x.shape[0]
    TB, num_tiles = _choose_tile(B, block_rows)

    # Advisory cost for XLA's scheduler (VMEM lane padding intentionally ignored).
    flops_per_row = 2 * GOAL_SIZE * HIDDEN + 2 * HIDDEN * EMBED_DIM
    weight_bytes = (2 * (GOAL_SIZE * HIDDEN + HIDDEN * EMBED_DIM)
                    + 4 * (HIDDEN + EMBED_DIM))
    cost = pl.CostEstimate(
        flops=B * flops_per_row,
        transcendentals=0,
        bytes_accessed=B * (GOAL_SIZE + EMBED_DIM) * 4 + weight_bytes,
    )

    return pl.pallas_call(
        goal_embedder_kernel,
        out_shape=jax.ShapeDtypeStruct((B, EMBED_DIM), jnp.float32),
        grid=(num_tiles,),
        in_specs=[
            # Streamed activations: new batch tile every grid step (ragged last
            # block handled by Pallas masking -- no host-side pad).
            pl.BlockSpec((TB, GOAL_SIZE), lambda i: (i, 0)),
            # Weights/biases: constant block index -> DMA'd once, VMEM-resident.
            pl.BlockSpec((GOAL_SIZE, HIDDEN), lambda i: (0, 0)),
            pl.BlockSpec((1, HIDDEN), lambda i: (0, 0)),
            pl.BlockSpec((HIDDEN, EMBED_DIM), lambda i: (0, 0)),
            pl.BlockSpec((1, EMBED_DIM), lambda i: (0, 0)),
        ],
        out_specs=pl.BlockSpec((TB, EMBED_DIM), lambda i: (i, 0)),
        compiler_params=pltpu.CompilerParams(
            # Independent batch tiles -> megacore sharding on v7x.
            dimension_semantics=("parallel",),
            # Needed on v5e (16 MiB default scoped); covers TB=8192 footprint.
            vmem_limit_bytes=32 * 1024 * 1024,
        ),
        cost_estimate=cost,
    )(x, w1, b1, w2, b2)


def init_params(key):
    """Init mimicking torch.nn.Linear default (uniform +-1/sqrt(fan_in)).

    Weights returned transposed to (in, out) and cast to bf16 (MXU operand
    dtype); biases stay f32 (added after the f32-accumulated matmul).
    """
    k1, k2, k3, k4 = jax.random.split(key, 4)
    bound1 = 1.0 / jnp.sqrt(GOAL_SIZE)
    bound2 = 1.0 / jnp.sqrt(HIDDEN)
    w1 = jax.random.uniform(k1, (GOAL_SIZE, HIDDEN), jnp.float32, -bound1, bound1)
    b1 = jax.random.uniform(k2, (1, HIDDEN), jnp.float32, -bound1, bound1)
    w2 = jax.random.uniform(k3, (HIDDEN, EMBED_DIM), jnp.float32, -bound2, bound2)
    b2 = jax.random.uniform(k4, (1, EMBED_DIM), jnp.float32, -bound2, bound2)
    return w1.astype(jnp.bfloat16), b1, w2.astype(jnp.bfloat16), b2


def reference_forward(x, w1, b1, w2, b2):
    """f32 reference (weights upcast); kernel uses bf16 operands -> relaxed tol."""
    h = jnp.maximum(x @ w1.astype(jnp.float32) + b1, 0.0)
    return jnp.maximum(h @ w2.astype(jnp.float32) + b2, 0.0)


if __name__ == "__main__":
    key = jax.random.PRNGKey(0)
    kx, kp = jax.random.split(key)

    w1, b1, w2, b2 = init_params(kp)

    # Small batch (single tile).
    batch = 8
    x = jax.random.normal(kx, (batch, GOAL_SIZE), jnp.float32)
    out = jax.block_until_ready(goal_embedder_forward(x, w1, b1, w2, b2))
    ref = reference_forward(x, w1, b1, w2, b2)
    assert out.shape == (batch, EMBED_DIM)
    # bf16 MXU operands vs f32 reference -> relaxed tolerance.
    assert jnp.allclose(out, ref, atol=5e-2, rtol=5e-2)

    # Multi-tile ragged path (B not a multiple of TB, even tile count, no pad).
    batch2 = 2500
    x2 = jax.random.normal(kx, (batch2, GOAL_SIZE), jnp.float32)
    out2 = jax.block_until_ready(goal_embedder_forward(x2, w1, b1, w2, b2))
    ref2 = reference_forward(x2, w1, b1, w2, b2)
    assert out2.shape == (batch2, EMBED_DIM)
    assert jnp.allclose(out2, ref2, atol=5e-2, rtol=5e-2)

    print("KERNEL_OK")
</pallas_src>

<mosaic_0001>
module attributes {stable_mosaic.version = 11 : i64} {
  func.func @goal_embedder_kernel(%arg0: i32, %arg1: memref<8x16xf32, #tpu.memory_space<vmem>>, %arg2: memref<16x128xbf16, #tpu.memory_space<vmem>>, %arg3: memref<1x128xf32, #tpu.memory_space<vmem>>, %arg4: memref<128x32xbf16, #tpu.memory_space<vmem>>, %arg5: memref<1x32xf32, #tpu.memory_space<vmem>>, %arg6: memref<8x32xf32, #tpu.memory_space<vmem>>) attributes {dimension_semantics = [#tpu.dimension_semantics<parallel>], iteration_bounds = array<i64: 1>, scalar_prefetch = 0 : i64, scratch_operands = 0 : i64, tpu.core_type = #tpu.core_type<tc>, window_params = [{transform_indices = @transform_0, window_bounds = array<i64: 8, 16>}, {pipeline_mode = #tpu.pipeline_mode<synchronous>, transform_indices = @transform_1, window_bounds = array<i64: 16, 128>}, {pipeline_mode = #tpu.pipeline_mode<synchronous>, transform_indices = @transform_2, window_bounds = array<i64: 1, 128>}, {pipeline_mode = #tpu.pipeline_mode<synchronous>, transform_indices = @transform_3, window_bounds = array<i64: 128, 32>}, {pipeline_mode = #tpu.pipeline_mode<synchronous>, transform_indices = @transform_4, window_bounds = array<i64: 1, 32>}, {transform_indices = @transform_5, window_bounds = array<i64: 8, 32>}]} {
    %c0 = arith.constant 0 : index
    %c0_0 = arith.constant 0 : index
    %0 = vector.load %arg1[%c0, %c0_0] : memref<8x16xf32, #tpu.memory_space<vmem>>, vector<8x16xf32>
    %1 = arith.truncf %0 : vector<8x16xf32> to vector<8x16xbf16>
    %c0_1 = arith.constant 0 : index
    %c0_2 = arith.constant 0 : index
    %2 = vector.load %arg2[%c0_1, %c0_2] : memref<16x128xbf16, #tpu.memory_space<vmem>>, vector<16x128xbf16>
    %cst = arith.constant dense<0.000000e+00> : vector<8x128xf32>
    %3 = tpu.matmul %1, %2, %cst {dimension_numbers = #tpu.dot_dimension_numbers<[1], [0], [0], [1], [0, 0, 1, 1], [], []>} : vector<8x16xbf16>, vector<16x128xbf16>, vector<8x128xf32> -> vector<8x128xf32>
    %c0_3 = arith.constant 0 : index
    %c0_4 = arith.constant 0 : index
    %4 = vector.load %arg3[%c0_3, %c0_4] : memref<1x128xf32, #tpu.memory_space<vmem>>, vector<1x128xf32>
    %5 = vector.broadcast %4 : vector<1x128xf32> to vector<8x128xf32>
    %6 = arith.addf %3, %5 : vector<8x128xf32>
    %cst_5 = arith.constant 0.000000e+00 : f32
    %7 = vector.broadcast %cst_5 : f32 to vector<8x128xf32>
    %8 = arith.maximumf %6, %7 : vector<8x128xf32>
    %9 = arith.truncf %8 : vector<8x128xf32> to vector<8x128xbf16>
    %c0_6 = arith.constant 0 : index
    %c0_7 = arith.constant 0 : index
    %10 = vector.load %arg4[%c0_6, %c0_7] : memref<128x32xbf16, #tpu.memory_space<vmem>>, vector<128x32xbf16>
    %cst_8 = arith.constant dense<0.000000e+00> : vector<8x32xf32>
    %11 = tpu.matmul %9, %10, %cst_8 {dimension_numbers = #tpu.dot_dimension_numbers<[1], [0], [0], [1], [0, 0, 1, 1], [], []>} : vector<8x128xbf16>, vector<128x32xbf16>, vector<8x32xf32> -> vector<8x32xf32>
    %c0_9 = arith.constant 0 : index
    %c0_10 = arith.constant 0 : index
    %12 = vector.load %arg5[%c0_9, %c0_10] : memref<1x32xf32, #tpu.memory_space<vmem>>, vector<1x32xf32>
    %13 = vector.broadcast %12 : vector<1x32xf32> to vector<8x32xf32>
    %14 = arith.addf %11, %13 : vector<8x32xf32>
    %cst_11 = arith.constant 0.000000e+00 : f32
    %15 = vector.broadcast %cst_11 : f32 to vector<8x32xf32>
    %16 = arith.maximumf %14, %15 : vector<8x32xf32>
    %c0_12 = arith.constant 0 : index
    %c0_13 = arith.constant 0 : index
    %17 = vector.load %arg6[%c0_12, %c0_13] : memref<8x32xf32, #tpu.memory_space<vmem>>, vector<8x32xf32>
    tpu.vector_store %arg6[%c0_12, %c0_13], %16 {strides = array<i32>} : memref<8x32xf32, #tpu.memory_space<vmem>>, vector<8x32xf32>,
    return
  }
  func.func @transform_0(%arg0: i32) -> (i32, i32) {
    %c0_i32 = arith.constant 0 : i32
    %c0_i32_0 = arith.constant 0 : i32
    return %arg0, %c0_i32 : i32, i32
  }
  func.func @transform_1(%arg0: i32) -> (i32, i32) {
    %c0_i32 = arith.constant 0 : i32
    %c0_i32_0 = arith.constant 0 : i32
    %c0_i32_1 = arith.constant 0 : i32
    return %c0_i32, %c0_i32_0 : i32, i32
  }
  func.func @transform_2(%arg0: i32) -> (i32, i32) {
    %c0_i32 = arith.constant 0 : i32
    %c0_i32_0 = arith.constant 0 : i32
    %c0_i32_1 = arith.constant 0 : i32
    return %c0_i32, %c0_i32_0 : i32, i32
  }
  func.func @transform_3(%arg0: i32) -> (i32, i32) {
    %c0_i32 = arith.constant 0 : i32
    %c0_i32_0 = arith.constant 0 : i32
    %c0_i32_1 = arith.constant 0 : i32
    return %c0_i32, %c0_i32_0 : i32, i32
  }
  func.func @transform_4(%arg0: i32) -> (i32, i32) {
    %c0_i32 = arith.constant 0 : i32
    %c0_i32_0 = arith.constant 0 : i32
    %c0_i32_1 = arith.constant 0 : i32
    return %c0_i32, %c0_i32_0 : i32, i32
  }
  func.func @transform_5(%arg0: i32) -> (i32, i32) {
    %c0_i32 = arith.constant 0 : i32
    %c0_i32_0 = arith.constant 0 : i32
    return %arg0, %c0_i32 : i32, i32
  }
}

</mosaic_0001>

<bundles_post_ra>
// kernel: tpu_custom_call.1
= control target key start
LH: loop header
LB: loop body
LE: loop exit
PB: predicated region body
PF: predicated region fallthrough
CT: control target
= control target key end

     0   :  { %vm36_vm0 = vcmask 130048   ;;  %s300_s0 = inlined_call_operand.vmem [shape: f32[8,16], index: 0, kind: input, shape index: {}]   ;;  %s301_s1 = inlined_call_operand.vmem [shape: bf16[16,128], index: 1, kind: input, shape index: {}]   ;;  %s302_s2 = inlined_call_operand.vmem [shape: f32[1,128], index: 2, kind: input, shape index: {}]   ;;  %s303_s3 = inlined_call_operand.vmem [shape: bf16[128,32], index: 3, kind: input, shape index: {}]   ;;  %s304_s4 = inlined_call_operand.vmem [shape: f32[1,32], index: 4, kind: input, shape index: {}]   ;;  %s305_s5 = inlined_call_operand.hbm [shape: f32[8,32], index: 5, kind: output, shape index: {}]  }
   0x1   :  { %v192_v0 = vld [vmem:[%s301_s1] sm:$0xff]  ;;  %v200_v2 = vld [vmem:[%s303_s3 + $0x38] sm:$0xff]  ;;  %v199_v4 = vld [vmem:[%s303_s3 + $0x30] sm:$0xff] }
   0x2   :  { %v22_v1 = vld [vmem:[%s300_s0] sm:$0xff]  ;;  %47 = vmatpush.bf16.msra.mxu0 %v192_v0  ;;  %123 = vmatpush.bf16.msra.mxu1 %v200_v2 }
   0x3   :  { %v23_v3 = vpack.c.bf16 %v22_v1, %v22_v1 }
   0x4   :  { %10 = vsyncpa [#allocation3], 0  ;;  %v198_v5 = vld [vmem:[%s303_s3 + $0x28] sm:$0xff]  ;;  %v197_v6 = vld [vmem:[%s303_s3 + $0x20] sm:$0xff]  ;;  %s230_s15 = smov [#allocation2]   ;;  %s146_s18 = sshll.u32 %s305_s5, 4  ;;  %s147_s18 = int_to_ptr.hbm [resolvable:$true] %s146_s18 }
   0x5   :  { %159 = vmatmul.msk.bf16.vlgmr.msra.gmra.mxu0 %vm36_vm0, %v23_v3  ;;  %v196_v7 = vld [vmem:[%s303_s3 + $0x18] sm:$0xff]  ;;  %v195_v8 = vld [vmem:[%s303_s3 + $0x10] sm:$0xff]  ;;  %v194_v9 = vld [vmem:[%s303_s3 + $0x8] sm:$0xff]  ;;  %s144_s16 = sshll.u32 %s230_s15, 4  ;;  %vm137_vm1 = vcmask 261120   ;;  %s145_s16 = int_to_ptr.vmem [resolvable:$true] %s144_s16 }
   0x6   :  { %124 = vmatpush.bf16.msra.mxu1 %v199_v4  ;;  %v193_v10 = vld [vmem:[%s303_s3] sm:$0xff] }
   0x7   :  { %v202_v11 = vld [vmem:[%s302_s2] ss:$0 sm:$0xff] }
   0x8   :  { %v203_v17 = vld [vmem:[%s304_s4] ss:$0 sm:$0xff] }
   0xa   :  { %125 = vmatpush.bf16.msra.mxu1 %v198_v5 }
   0xe   :  { %126 = vmatpush.bf16.msra.mxu1 %v197_v6 }
  0x12   :  { %127 = vmatpush.bf16.msra.mxu1 %v196_v7 }
  0x16   :  { %128 = vmatpush.bf16.msra.mxu1 %v195_v8 }
  0x1a   :  { %129 = vmatpush.bf16.msra.mxu1 %v194_v9 }
  0x1e   :  { %130 = vmatpush.bf16.msra.mxu1 %v193_v10 }
  0x82   :  { %v49_v12 = vpop.f32.mrf.mxu0 }
  0x83   :  { %v50_v13 = vadd.f32 %v202_v11, %v49_v12 }
  0x85   :  { %v53_v14 = vmax.f32 %v50_v13, 0.0 }
  0x87   :  { %v54_v15 = vpack.c.bf16 %v53_v14, %v53_v14 }
  0x89   :  { %131 = vmatmul.bf16.vlgmr.msra.gmra.mxu1 %v54_v15 }
  0x8a   :  { %v51_v16 = vpop.f32.mrf.mxu0 }
 0x106   :  { %v132_v18 = vpop.f32.mrf.mxu1 }
 0x107   :  { %v133_v19 = vadd.f32 %v203_v17, %v132_v18 }
 0x109   :  { %v136_v20 = vmax.f32 %v133_v19, 0.0 }
 0x10b   :  { %138 = vst.msk [vmem:[#allocation2] sm:$0xff] %vm137_vm1, %v136_v20 }
 0x10c   :  { %149 = dma.vmem_to_hbm [thread:$0]  %s145_s16, 128, %s147_s18, [#allocation3]  }
 0x10e   :  { %v134_v21 = vpop.f32.mrf.mxu1 }
 0x10f   :  { %228 = dma.done.wait [#allocation3], 128  }
 0x110   :  { %229 = vsyncadd [#allocation3], 4294967168 }
 0x111   :  { %154 = vsyncpa [#allocation3], 1 }

</bundles_post_ra>
